<compile_context>
chip_gen: v7x
topology: tpu7x:2x2x1
jax: 0.10.0
libtpu: 0.0.40
codegen_flags: <defaults>
</compile_context>

<pallas_src>
import jax
import jax.numpy as jnp
from jax.experimental import pallas as pl
from jax.experimental.pallas import tpu as pltpu


def _add_noise_kernel(x_ref, n_ref, w_ref, o_ref):
    """One (batch, spatial-tile) per grid step.

    x_ref : (1, C, BHW) f32   channels on sublanes, flattened spatial on lanes
    n_ref : (1, 1, BHW) f32   noise, shared across channels (torch.randn(B,1,H,W))
    w_ref : (C, 1)      f32   per-channel noise weight
    o_ref : (1, C, BHW) f32
    """
    x = x_ref[0]                                   # (C, BHW)
    noise = n_ref[0]                               # (1, BHW)
    y = x + w_ref[...] * noise                     # (C,1)*(1,BHW) -> (C,BHW)
    o_ref[0] = jnp.where(y >= 0.0, y, 0.2 * y)     # leaky_relu(0.2)


def _pick_block_hw(C, HW, max_tile_bytes=2 * 1024 * 1024):
    """Largest spatial tile that keeps lanes dense (multiple of 128) while keeping
    the f32 (C, tile) blocks small enough that the double-buffered pipeline stays
    well inside every chip's scoped-VMEM budget."""
    if HW % 128 != 0:
        return HW                      # full-extent block is always layout-legal
    blk = HW
    while blk % 256 == 0 and C * blk * 4 > max_tile_bytes:
        blk //= 2
    return blk


def add_noise(x, weight, key, *, block_hw=None):
    """Pallas TPU implementation of AddNoise.forward.

    x:      (B, C, H, W) float32   (NCHW, like PyTorch)
    weight: (C,)         float32
    key:    jax PRNG key used for the injected N(0,1) noise
    returns (B, C, H, W) float32
    """
    B, C, H, W = x.shape
    HW = H * W
    if block_hw is None:
        block_hw = _pick_block_hw(C, HW)
    assert HW % block_hw == 0
    nt = HW // block_hw

    x3 = x.reshape(B, C, HW).astype(jnp.float32)      # free reshape, stays NCHW
    n3 = jax.random.normal(key, (B, 1, HW), jnp.float32)
    w2 = weight.reshape(C, 1).astype(jnp.float32)

    out = pl.pallas_call(
        _add_noise_kernel,
        out_shape=jax.ShapeDtypeStruct((B, C, HW), jnp.float32),
        grid=(B, nt),
        in_specs=[
            pl.BlockSpec((1, C, block_hw), lambda b, t: (b, 0, t)),
            pl.BlockSpec((1, 1, block_hw), lambda b, t: (b, 0, t)),
            pl.BlockSpec((C, 1), lambda b, t: (0, 0)),
        ],
        out_specs=pl.BlockSpec((1, C, block_hw), lambda b, t: (b, 0, t)),
        compiler_params=pltpu.CompilerParams(
            dimension_semantics=("parallel", "parallel"),
            vmem_limit_bytes=32 * 1024 * 1024,
        ),
    )(x3, n3, w2)
    return out.reshape(B, C, H, W)


# ----------------------------------------------------------------------------
if __name__ == "__main__":
    B, C, H, W = 2, 4, 16, 16

    key = jax.random.PRNGKey(0)
    kx, kn0, kn1 = jax.random.split(key, 3)
    x = jax.random.normal(kx, (B, C, H, W), jnp.float32)

    # 1) PyTorch init (weight = zeros): AddNoise reduces to exactly leaky_relu(x),
    #    independent of the noise values.
    out0 = jax.block_until_ready(add_noise(x, jnp.zeros((C,), jnp.float32), kn0))
    ref0 = jnp.where(x >= 0.0, x, 0.2 * x)
    assert out0.shape == (B, C, H, W), out0.shape
    assert bool(jnp.all(jnp.isfinite(out0)))
    assert float(jnp.max(jnp.abs(out0 - ref0))) < 1e-6

    # 2) Non-zero weight: exact reference, since the kernel consumes the same
    #    jax.random.normal(kn1, (B, 1, HW)) noise (shared across channels).
    wgt = 0.05 * (1.0 + jnp.arange(C, dtype=jnp.float32))
    noise = jax.random.normal(kn1, (B, 1, H * W), jnp.float32).reshape(B, 1, H, W)
    out1 = jax.block_until_ready(add_noise(x, wgt, kn1))
    pre = x + wgt[None, :, None, None] * noise
    ref1 = jnp.where(pre >= 0.0, pre, 0.2 * pre)
    assert bool(jnp.all(jnp.isfinite(out1)))
    assert float(jnp.max(jnp.abs(out1 - ref1))) < 1e-5

    print("KERNEL_OK")
</pallas_src>

<mosaic_0001>
module attributes {stable_mosaic.version = 11 : i64} {
  func.func @_add_noise_kernel(%arg0: i32, %arg1: i32, %arg2: memref<1x4x256xf32, #tpu.memory_space<vmem>>, %arg3: memref<1x1x256xf32, #tpu.memory_space<vmem>>, %arg4: memref<4x1xf32, #tpu.memory_space<vmem>>, %arg5: memref<1x4x256xf32, #tpu.memory_space<vmem>>) attributes {dimension_semantics = [#tpu.dimension_semantics<parallel>, #tpu.dimension_semantics<parallel>], iteration_bounds = array<i64: 2, 1>, scalar_prefetch = 0 : i64, scratch_operands = 0 : i64, tpu.core_type = #tpu.core_type<tc>, window_params = [{transform_indices = @transform_0, window_bounds = array<i64: 1, 4, 256>}, {transform_indices = @transform_1, window_bounds = array<i64: 1, 1, 256>}, {pipeline_mode = #tpu.pipeline_mode<synchronous>, transform_indices = @transform_2, window_bounds = array<i64: 4, 1>}, {transform_indices = @transform_3, window_bounds = array<i64: 1, 4, 256>}]} {
    %c0 = arith.constant 0 : index
    %c0_0 = arith.constant 0 : index
    %c0_1 = arith.constant 0 : index
    %0 = vector.load %arg2[%c0, %c0_0, %c0_1] : memref<1x4x256xf32, #tpu.memory_space<vmem>>, vector<1x4x256xf32>
    %1 = vector.shape_cast %0 : vector<1x4x256xf32> to vector<4x256xf32>
    %c0_2 = arith.constant 0 : index
    %c0_3 = arith.constant 0 : index
    %c0_4 = arith.constant 0 : index
    %2 = vector.load %arg3[%c0_2, %c0_3, %c0_4] : memref<1x1x256xf32, #tpu.memory_space<vmem>>, vector<1x1x256xf32>
    %3 = vector.shape_cast %2 : vector<1x1x256xf32> to vector<1x256xf32>
    %c0_5 = arith.constant 0 : index
    %c0_6 = arith.constant 0 : index
    %4 = vector.load %arg4[%c0_5, %c0_6] : memref<4x1xf32, #tpu.memory_space<vmem>>, vector<4x1xf32>
    %5 = vector.broadcast %4 : vector<4x1xf32> to vector<4x256xf32>
    %6 = vector.broadcast %3 : vector<1x256xf32> to vector<4x256xf32>
    %7 = arith.mulf %5, %6 : vector<4x256xf32>
    %8 = arith.addf %1, %7 : vector<4x256xf32>
    %cst = arith.constant 0.000000e+00 : f32
    %9 = vector.broadcast %cst : f32 to vector<4x256xf32>
    %10 = arith.cmpf oge, %8, %9 : vector<4x256xf32>
    %cst_7 = arith.constant 2.000000e-01 : f32
    %11 = vector.broadcast %cst_7 : f32 to vector<4x256xf32>
    %12 = arith.mulf %11, %8 : vector<4x256xf32>
    %13 = arith.select %10, %8, %12 : vector<4x256xi1>, vector<4x256xf32>
    %c0_8 = arith.constant 0 : index
    %c0_9 = arith.constant 0 : index
    %c0_10 = arith.constant 0 : index
    %14 = vector.load %arg5[%c0_8, %c0_9, %c0_10] : memref<1x4x256xf32, #tpu.memory_space<vmem>>, vector<1x4x256xf32>
    %15 = vector.shape_cast %14 : vector<1x4x256xf32> to vector<4x256xf32>
    %16 = vector.shape_cast %13 : vector<4x256xf32> to vector<1x4x256xf32>
    tpu.vector_store %arg5[%c0_8, %c0_9, %c0_10], %16 {strides = array<i32>} : memref<1x4x256xf32, #tpu.memory_space<vmem>>, vector<1x4x256xf32>,
    return
  }
  func.func @transform_0(%arg0: i32, %arg1: i32) -> (i32, i32, i32) {
    %c0_i32 = arith.constant 0 : i32
    %c0_i32_0 = arith.constant 0 : i32
    return %arg0, %c0_i32, %arg1 : i32, i32, i32
  }
  func.func @transform_1(%arg0: i32, %arg1: i32) -> (i32, i32, i32) {
    %c0_i32 = arith.constant 0 : i32
    %c0_i32_0 = arith.constant 0 : i32
    return %arg0, %c0_i32, %arg1 : i32, i32, i32
  }
  func.func @transform_2(%arg0: i32, %arg1: i32) -> (i32, i32) {
    %c0_i32 = arith.constant 0 : i32
    %c0_i32_0 = arith.constant 0 : i32
    %c0_i32_1 = arith.constant 0 : i32
    return %c0_i32, %c0_i32_0 : i32, i32
  }
  func.func @transform_3(%arg0: i32, %arg1: i32) -> (i32, i32, i32) {
    %c0_i32 = arith.constant 0 : i32
    %c0_i32_0 = arith.constant 0 : i32
    return %arg0, %c0_i32, %arg1 : i32, i32, i32
  }
}

</mosaic_0001>

<bundles_post_ra>
// kernel: tpu_custom_call.1
= control target key start
LH: loop header
LB: loop body
LE: loop exit
PB: predicated region body
PF: predicated region fallthrough
CT: control target
= control target key end

     0   :  { %8 = vsyncpa [#allocation3], 0  ;;  %s785_s0 = inlined_call_operand.hbm [shape: f32[2,4,256], index: 0, kind: input, shape index: {}]   ;;  %s786_s1 = inlined_call_operand.vmem [shape: f32[2,1,256], index: 1, kind: input, shape index: {}]   ;;  %s787_s2 = inlined_call_operand.vmem [shape: f32[4,1], index: 2, kind: input, shape index: {}]   ;;  %s788_s3 = inlined_call_operand.hbm [shape: f32[2,4,256], index: 3, kind: output, shape index: {}]  }
   0x1   :  { %10 = vsyncpa [#allocation3 + $0x1], 0 }
   0x2   :  { %11 = vsyncpa [#allocation4], 0 }
   0x3   :  { %13 = vsyncpa [#allocation4 + $0x1], 0  ;;  %s605_s12 = smov 0   ;;  %s607_s13 = smov 0  }
   0x4   :  { %s609_s14 = smov 0   ;;  %s611_s15 = smov 0  }
   0x5   :  { %s613_s16 = smov 0   ;;  %s615_s17 = smov 0  }
   0x6 LB: > { %s386_s18 = sadd.s32 4294967295, %s580_s17   ;;  %s387_s19 = sadd.s32 4294967294, %s580_s17   ;;  %s580_s17 = sphi %s615_s17, %s19_s17   ;;  %s576_s16 = sphi %s613_s16, %s804_s16   ;;  %s572_s15 = sphi %s611_s15, %s803_s15   ;;  %s568_s14 = sphi %s609_s14, %s802_s14   ;;  %s564_s13 = sphi %s607_s13, %s801_s13   ;;  %s560_s12 = sphi %s605_s12, %s800_s12  }
   0x7   : > { %s31_s20 = sadd.s32 1, %s576_s16  ;;  %s40_s21 = sadd.s32 1, %s568_s14 }
   0x8   : > { %p33_p0 = scmp.ge.s32.totalorder %s31_s20, 2  ;;  %p47_p1 = scmp.ne.s32.totalorder %s568_s14, %s564_s13 }
   0x9   : > { %p48_p2 = scmp.eq.s32.totalorder %s580_s17, 0  ;;  %p53_p3 = scmp.ne.s32.totalorder %s564_s13, %s560_s12 }
   0xa   : > { %s806_s20 = smov (%p33_p0, %s31_s20), 0  ;;  %p54_p5 = scmp.eq.s32.totalorder %s386_s18, 0 }
   0xb   : > { %p646_p4 = por %p48_p2, %p47_p1  ;;  %s35_s23 = ssub.s32 %s576_s16, %s806_s20 }
   0xc   : > { %p128_p6 = scmp.eq.s32.totalorder %s386_s18, 1  ;;  %p38_p7 = scmp.eq.s32.totalorder %s35_s23, 0 }
   0xd   : > { %p652_p8 = por %p54_p5, %p53_p3  ;;  %p134_p10 = scmp.eq.s32.totalorder %s387_s19, 1 }
   0xe   : > { %p656_p9 = por %p128_p6, %p47_p1  ;;  %p416_p13 = scmp.lt.s32.totalorder %s580_s17, 2 }
   0xf   : > { %s661_s26 = scalar_select %p38_p7, %s568_s14, %s40_s21  }
  0x10   : > { %s792_s25 = scalar_select %p656_p9, 1, 0 }
  0x11   : > { %p663_p11 = por %p134_p10, %p53_p3  ;;  %s157_s28 = sand.u32 1, %s568_s14  }
  0x12   : > { %s390_s29 = sshll.u32 %s157_s28, 3  ;;  %s402_s30 = sshll.u32 %s576_s16, 7 }
  0x13   : > { %s793_s27 = scalar_select %p663_p11, 1, 0 }
  0x14   : > { %s674_s6 = scalar_lea.hbm %s785_s0, %s402_s30  ;;  %s161_s7 = scalar_lea.vmem [#allocation2], %s390_s29 }
  0x15   : > { %s171_s8 = sshll.u32 %s161_s7, 4  ;;  %p680_p0 = pnand %p416_p13, %p646_p4  ;;  %s676_s8 = int_to_ptr.vmem [resolvable:$true] %s171_s8 }
  0x16   : > { %s158_s10 = scalar_lea.sflag [#allocation3], %s157_s28  ;;  %s468_s11 = scalar_lea.hbm %s674_s6, 128 }
  0x17   : > { %p469_p3 = scmp.ne.s32.totalorder %s674_s6, %s468_s11  ;;  %p470_p5 = pneg %p680_p0 }
  0x18   : > { %s473_s21 = scalar_lea.hbm %s785_s0, 256  ;;  %p474_p4 = scmp.lt.u32.totalorder %s674_s6, %s785_s0 }
  0x19   : > { %p471_p6 = pnand %p470_p5, %p469_p3  ;;  %p475_p10 = scmp.lt.u32.totalorder %s473_s21, %s468_s11 }
  0x1a   : > { %p477_p12 = scmp.lt.u32.totalorder %s468_s11, %s674_s6 }
  0x1b   : > { %p472_p7 = pneg %p471_p6  ;;  %p476_p13 = por %p475_p10, %p474_p4 }
  0x1d   : > { %p478_p1 = por %p477_p12, %p476_p13 }
  0x1f   : > { %p479_p2 = pnand %p478_p1, %p472_p7 }
  0x21   : > { %482 = shalt.err (!%p479_p2)
}
  0x22   : > { %s483_s28 = scalar_lea.vmem %s676_s8, 128  ;;  %s582_s29 = smov [#allocation2]  }
  0x23   : > { %p484_p3 = scmp.ne.s32.totalorder %s676_s8, %s483_s28  ;;  %s488_s30 = sshll.u32 %s582_s29, 4  ;;  %s489_s30 = int_to_ptr.vmem [resolvable:$false] %s488_s30 }
  0x24   : > { %s490_s4 = scalar_lea.vmem %s489_s30, 256  ;;  %p491_p9 = scmp.lt.s32.totalorder %s676_s8, %s489_s30 }
  0x25   : > { %p486_p6 = pnand %p484_p3, %p470_p5  ;;  %p492_p4 = scmp.lt.s32.totalorder %s490_s4, %s483_s28 }
  0x27   : > { %p487_p11 = pneg %p486_p6  ;;  %p493_p10 = por %p492_p4, %p491_p9 }
  0x29   : > { %p494_p12 = pnand %p493_p10, %p487_p11 }
  0x2b   : > { %497 = shalt.err (!%p494_p12)
}
  0x2c   : > { %411 = dma.hbm_to_vmem [thread:$0]  (!%p680_p0), %s674_s6, 128, %s676_s8, %s158_s10  }
  0x2d   : > { %p795_p1 = scmp.lt.s32.totalorder %s580_s17, 3  ;;  %p796_p2 = scmp.ge.s32.totalorder %s580_s17, 1 }
  0x2f   : > { %p189_p5 = pnand %p796_p2, %p795_p1 }
  0x30   : > { %s716_s5 = sand.u32 (!%p189_p5), 1, %s564_s13  }
  0x31   : > { %192 = sbr.rel (%p189_p5) target bundleno = 210 (0xd2), region = 32  ;;  %s394_s7 = sshll.u32 (!%p189_p5), %s716_s5, 3 }
  0x32   : > { %s195_s11 = scalar_lea.sflag (!%p189_p5), [#allocation3], %s716_s5  ;;  %s198_s18 = scalar_lea.vmem (!%p189_p5), [#allocation2], %s394_s7 }
  0x38   : > { %551 = dma.done.wait (%p652_p8), %s195_s11, 128  }
  0x39   : > { %553 = vsyncadd (%p652_p8), %s195_s11, 4294967168  ;;  %v583_v0 = vmov 0   ;;  %v242_v1 = vld [vmem:[%s787_s2] sm:$0xf]  ;;  %p231_p9 = scmp.lt.s32.totalorder %s572_s15, 1  ;;  %v249_v2 = vlaneseq  ;;  %s403_s22 = sshll.u32 %s572_s15, 7 }
  0x3a   : > { %467 = vset.pattern.permute.xlu0 %v583_v0  ;;  %v240_v12 = vld [vmem:[%s198_s18] sm:$0xff]  ;;  %s228_s23 = scalar_lea.vmem [#allocation5], %s394_s7  ;;  %s736_s4 = scalar_lea.hbm %s788_s3, %s403_s22 }
  0x3b   : > { %245 = vperm.xlu0 %467, %v242_v1   ;;  %s232_s9 = scalar_select %p231_p9, %s572_s15, 1  ;;  %v250_v3 = vshrl.u32 %v249_v2, 7 }
  0x3c   : > { %s287_s28 = sshll.u32 %s228_s23, 4  ;;  %s271_s11 = scalar_lea.sflag [#allocation4], %s716_s5  ;;  %s738_s28 = int_to_ptr.vmem [resolvable:$true] %s287_s28 }
  0x3d   : > { %s396_s10 = sshll.u32 %s232_s9, 1  ;;  %v251_v4 = vsub.s32 0, %v250_v3  ;;  %v255_v5 = vsub.s32 1, %v250_v3  ;;  %s498_s18 = scalar_lea.vmem %s738_s28, 128 }
  0x3e   : > { %s237_s24 = scalar_lea.vmem %s786_s1, %s396_s10  ;;  %p499_p8 = scmp.ne.s32.totalorder %s738_s28, %s498_s18 }
  0x3f   : > { %v241_v6 = vld [vmem:[%s237_s24] sm:$0x3]  ;;  %p797_p11 = scmp.ne.s32.totalorder %s792_s25, 0  ;;  %s584_s15 = smov [#allocation5]  }
  0x40   : > { %v252_v7 = vrot.slane %v241_v6, %v251_v4  ;;  %v256_v8 = vrot.slane %v241_v6, %v255_v5  ;;  %s502_s7 = sshll.u32 %s584_s15, 4  ;;  %s503_s7 = int_to_ptr.vmem [resolvable:$false] %s502_s7 }
  0x41   : > { %p500_p0 = pnand %p499_p8, %p797_p11  ;;  %s504_s6 = scalar_lea.vmem %s503_s7, 256 }
  0x42   : > { %p505_p13 = scmp.lt.s32.totalorder %s738_s28, %s503_s7  ;;  %p506_p3 = scmp.lt.s32.totalorder %s504_s6, %s498_s18 }
  0x43   : > { %p501_p7 = pneg %p500_p0 }
  0x44   : > { %p507_p6 = por %p506_p3, %p505_p13 }
  0x46   : > { %p508_p4 = pnand %p507_p6, %p501_p7 }
  0xba   : > { %v246_v9 = vpop.permute.xlu0 %245 }
  0xbb   : > { %v259_v10 = vmul.f32 %v252_v7, %v246_v9  ;;  %v260_v11 = vmul.f32 %v256_v8, %v246_v9 }
  0xbd   : > { %v263_v13 = vcombine.low %v259_v10, %v260_v11 }
  0xbf   : > { %v265_v14 = vadd.f32 %v263_v13, %v240_v12 }
  0xc1   : > { %vm266_vm0 = vcmp.ge.f32.partialorder %v265_v14, 0.0  ;;  %v267_v15 = vmul.f32 0.2, %v265_v14 }
  0xc3   : > { %v268_v16 = vsel %vm266_vm0, %v265_v14, %v267_v15 }
  0xc4   : > { %269 = vst [vmem:[%s228_s23] sm:$0xff] %v268_v16 }
  0xc5   : > { %511 = shalt.err (!%p508_p4)
}
  0xc6   : > { %s512_s5 = scalar_lea.hbm %s736_s4, 128  ;;  %s516_s10 = scalar_lea.hbm %s788_s3, 256 }
  0xc7   : > { %p513_p10 = scmp.ne.s32.totalorder %s736_s4, %s512_s5  ;;  %p517_p2 = scmp.lt.u32.totalorder %s736_s4, %s788_s3 }
  0xc8   : > { %p518_p5 = scmp.lt.u32.totalorder %s516_s10, %s512_s5  ;;  %p520_p8 = scmp.lt.u32.totalorder %s512_s5, %s736_s4 }
  0xc9   : > { %p514_p12 = pnand %p513_p10, %p797_p11 }
  0xca   : > { %p519_p9 = por %p518_p5, %p517_p2 }
  0xcb   : > { %p515_p1 = pneg %p514_p12 }
  0xcc   : > { %p521_p0 = por %p520_p8, %p519_p9 }
  0xce   : > { %p522_p7 = pnand %p521_p0, %p515_p1 }
  0xd0   : > { %525 = shalt.err (!%p522_p7)
}
  0xd1   : > { %406 = dma.vmem_to_hbm [thread:$0]  (%p797_p11), %s738_s28, 128, %s736_s4, %s271_s11  }
  0xd2 PF: > { %s299_s24 = sand.u32 1, %s560_s12   ;;  %p798_p13 = scmp.ne.s32.totalorder %s793_s27, 0 }
  0xd3   : > { %p799_p3 = scmp.ge.s32.totalorder %s580_s17, 2  ;;  %s300_s22 = scalar_lea.sflag [#allocation4], %s299_s24 }
  0xd5   : > { %p413_p6 = pnand %p799_p3, %p798_p13 }
  0xd7   : > { %555 = dma.done.wait (!%p413_p6), %s300_s22, 128  }
  0xd8   : > { %557 = vsyncadd (!%p413_p6), %s300_s22, 4294967168  ;;  %s19_s17 = sadd.s32 1, %s580_s17   ;;  %s800_s12 = smov %s564_s13 }
  0xd9   : > { %p16_p4 = scmp.ge.s32.totalorder %s19_s17, 4   ;;  %s801_s13 = smov %s568_s14 }
  0xda   : > { %s802_s14 = smov %s661_s26  ;;  %s803_s15 = smov %s576_s16 }
  0xdb   : > { %s804_s16 = smov %s806_s20  ;;  %18 = sbr.rel (!%p16_p4) target bundleno = 6 (0x6), region = 80 }
  0xe2   :  { %305 = vsyncpa [#allocation3], 1 }
  0xe3   :  { %307 = vsyncpa [#allocation3 + $0x1], 1 }
  0xe4   :  { %308 = vsyncpa [#allocation4], 1 }
  0xe5   :  { %310 = vsyncpa [#allocation4 + $0x1], 1 }

</bundles_post_ra>
